<compile_context>
chip_gen: v6e
topology: v6e:2x2x1
jax: 0.10.0
libtpu: 0.0.40
codegen_flags: <defaults>
</compile_context>

<pallas_src>
import jax
import jax.numpy as jnp
from jax.experimental import pallas as pl
from jax.experimental.pallas import tpu as pltpu


def _choose_tile(hw, bytes_per_col, budget=10 << 20):
    """Largest lane-friendly spatial tile dividing H*W that fits the VMEM budget."""
    if hw % 128 != 0:
        # TODO(synk): pad HW to a multiple of 128 (or fold N into the lane axis) for
        # 128-indivisible spatial sizes; the full-width block below is correct but
        # produces lane-masked vectors.
        return hw
    for cand in (4096, 2048, 1024, 512, 256, 128):
        if hw % cand == 0 and cand * bytes_per_col <= budget:
            return cand
    return 128


# ---- pass 1 kernel: per-channel sums / sums-of-squares of W_g@g and W_x@x ----
# Accumulates over the "arbitrary" spatial axis directly into the VMEM-resident
# output block (one writeback per batch index).  Conv biases are handled
# analytically in the wrapper (they shift the mean, cancel in the variance).
def _stats_kernel(g_ref, x_ref, wg_ref, wx_ref, stats_ref):
    @pl.when(pl.program_id(1) == 0)
    def _():
        stats_ref[...] = jnp.zeros_like(stats_ref)

    g1 = jnp.dot(wg_ref[...], g_ref[0], preferred_element_type=jnp.float32)  # (F_int, T)
    x1 = jnp.dot(wx_ref[...], x_ref[0], preferred_element_type=jnp.float32)  # (F_int, T)
    upd = jnp.concatenate(
        [jnp.sum(g1, axis=1, keepdims=True),
         jnp.sum(g1 * g1, axis=1, keepdims=True),
         jnp.sum(x1, axis=1, keepdims=True),
         jnp.sum(x1 * x1, axis=1, keepdims=True)],
        axis=1)                                                               # (F_int, 4)
    stats_ref[0] = stats_ref[0] + upd


# ---- pass 2 kernel: BN-folded 1x1 convs + ReLU + psi 1x1 conv (pre-BN) ----
# Also accumulates sum(p) / sum(p^2) for the psi BatchNorm (no HBM re-read of p).
def _fuse_kernel(g_ref, x_ref, wg_ref, wx_ref, bsum_ref, wpsi_ref, p_ref, pstat_ref):
    @pl.when(pl.program_id(1) == 0)
    def _():
        pstat_ref[...] = jnp.zeros_like(pstat_ref)

    a = jnp.dot(wg_ref[...], g_ref[0], preferred_element_type=jnp.float32)
    a = a + jnp.dot(wx_ref[...], x_ref[0], preferred_element_type=jnp.float32)
    s = jnp.maximum(a + bsum_ref[...], 0.0)                                   # (F_int, T)
    p = jnp.dot(wpsi_ref[...], s, preferred_element_type=jnp.float32)         # (1, T)
    p_ref[0] = p
    upd = jnp.concatenate(
        [jnp.sum(p, axis=1, keepdims=True),
         jnp.sum(p * p, axis=1, keepdims=True)],
        axis=0)                                                               # (2, 1)
    pstat_ref[0] = pstat_ref[0] + upd


# ---- pass 3 kernel: out = x * sigmoid(scale_p * p + shift_p) ----
def _gate_kernel(x_ref, p_ref, pp_ref, o_ref):
    psi = jax.nn.sigmoid(pp_ref[0] * p_ref[0] + pp_ref[1])                    # (1, T) f32
    o_ref[0] = (x_ref[0] * psi).astype(o_ref.dtype)                           # bcast over C


def attention_block_forward(g, x,
                            w_g, b_g, gamma_g, beta_g,
                            w_x, b_x, gamma_x, beta_x,
                            w_psi, b_psi, gamma_psi, beta_psi,
                            eps=1e-5):
    """Forward of PyTorch `Attention_block` (training-mode BatchNorm). NCHW in/out.

    Note: under training-mode BatchNorm the 1x1-conv biases (b_g, b_x, b_psi) cancel
    exactly (they shift the batch mean by the same constant), so they do not affect
    the output; they are accepted for API fidelity.
    """
    del b_g, b_x, b_psi  # cancelled by training-mode BatchNorm (see docstring)
    N, F_g, H, W = g.shape
    _, F_l, _, _ = x.shape
    F_int = w_g.shape[0]
    HW = H * W
    dt = x.dtype
    isz = x.dtype.itemsize
    f32 = jnp.float32

    # VMEM budget per lane-column: double-buffered g/x inputs, pass-3 output,
    # F_int-channel intermediate, plus slack for the (1, T) psi row.
    bytes_per_col = 2 * (F_g + F_l) * isz + 2 * F_l * isz + F_int * 4 + 16
    T = _choose_tile(HW, bytes_per_col)
    nt = HW // T

    g_r = g.reshape(N, F_g, HW)        # native dtype: reshape only, no extra HBM pass
    x_r = x.reshape(N, F_l, HW)
    wg2 = w_g.reshape(F_int, F_g).astype(dt)
    wx2 = w_x.reshape(F_int, F_l).astype(dt)
    wpsi2 = w_psi.reshape(1, F_int).astype(f32)

    vmem_lim = 32 * 1024 * 1024
    cp_red = pltpu.CompilerParams(dimension_semantics=("parallel", "arbitrary"),
                                  vmem_limit_bytes=vmem_lim)
    cp_par = pltpu.CompilerParams(dimension_semantics=("parallel", "parallel"),
                                  vmem_limit_bytes=vmem_lim)

    in_bytes = N * HW * (F_g + F_l) * isz

    # ---- pass 1: batch statistics of the two 1x1 convs (accumulated in VMEM) ----
    stats = pl.pallas_call(
        _stats_kernel,
        grid=(N, nt),
        in_specs=[
            pl.BlockSpec((1, F_g, T), lambda n, t: (n, 0, t)),
            pl.BlockSpec((1, F_l, T), lambda n, t: (n, 0, t)),
            pl.BlockSpec((F_int, F_g), lambda n, t: (0, 0)),
            pl.BlockSpec((F_int, F_l), lambda n, t: (0, 0)),
        ],
        out_specs=pl.BlockSpec((1, F_int, 4), lambda n, t: (n, 0, 0)),
        out_shape=jax.ShapeDtypeStruct((N, F_int, 4), f32),
        compiler_params=cp_red,
        cost_estimate=pl.CostEstimate(
            flops=2 * N * HW * F_int * (F_g + F_l) + 4 * N * HW * F_int,
            transcendentals=0,
            bytes_accessed=in_bytes + N * F_int * 4 * 4),
    )(g_r, x_r, wg2, wx2)

    count = N * HW
    tot = jnp.sum(stats, axis=0)                              # (F_int, 4), tiny
    mean_g = tot[:, 0] / count                                # mean of bias-free conv
    var_g = jnp.maximum(tot[:, 1] / count - mean_g ** 2, 0.0)
    mean_x = tot[:, 2] / count
    var_x = jnp.maximum(tot[:, 3] / count - mean_x ** 2, 0.0)

    scale_g = gamma_g.astype(f32) * jax.lax.rsqrt(var_g + eps)
    scale_x = gamma_x.astype(f32) * jax.lax.rsqrt(var_x + eps)
    # BN(W z + b) in training mode == (scale*W) z + (beta - scale*mean_{bias-free}).
    shift_g = beta_g.astype(f32) - scale_g * mean_g
    shift_x = beta_x.astype(f32) - scale_x * mean_x
    wg_f = (wg2.astype(f32) * scale_g[:, None]).astype(dt)
    wx_f = (wx2.astype(f32) * scale_x[:, None]).astype(dt)
    b_sum = (shift_g + shift_x).reshape(F_int, 1)             # f32

    # ---- pass 2: s = ReLU(BN(conv_g)+BN(conv_x)); p = W_psi@s; psi stats accumulated ----
    p, pstats = pl.pallas_call(
        _fuse_kernel,
        grid=(N, nt),
        in_specs=[
            pl.BlockSpec((1, F_g, T), lambda n, t: (n, 0, t)),
            pl.BlockSpec((1, F_l, T), lambda n, t: (n, 0, t)),
            pl.BlockSpec((F_int, F_g), lambda n, t: (0, 0)),
            pl.BlockSpec((F_int, F_l), lambda n, t: (0, 0)),
            pl.BlockSpec((F_int, 1), lambda n, t: (0, 0)),
            pl.BlockSpec((1, F_int), lambda n, t: (0, 0)),
        ],
        out_specs=(
            pl.BlockSpec((1, 1, T), lambda n, t: (n, 0, t)),
            pl.BlockSpec((1, 2, 1), lambda n, t: (n, 0, 0)),
        ),
        out_shape=(
            jax.ShapeDtypeStruct((N, 1, HW), f32),
            jax.ShapeDtypeStruct((N, 2, 1), f32),
        ),
        compiler_params=cp_red,
        cost_estimate=pl.CostEstimate(
            flops=2 * N * HW * F_int * (F_g + F_l + 1) + 6 * N * HW * F_int,
            transcendentals=0,
            bytes_accessed=in_bytes + N * HW * 4),
    )(g_r, x_r, wg_f, wx_f, b_sum, wpsi2)

    ptot = jnp.sum(pstats, axis=0)                            # (2, 1), tiny
    mean_p = ptot[0, 0] / count
    var_p = jnp.maximum(ptot[1, 0] / count - mean_p ** 2, 0.0)
    scale_p = gamma_psi.astype(f32)[0] * jax.lax.rsqrt(var_p + eps)
    shift_p = beta_psi.astype(f32)[0] - scale_p * mean_p
    pp = jnp.stack([scale_p, shift_p]).astype(f32)            # (2,) scalars -> SMEM

    # ---- pass 3: out = x * sigmoid(BN(psi)) ----
    out = pl.pallas_call(
        _gate_kernel,
        grid=(N, nt),
        in_specs=[
            pl.BlockSpec((1, F_l, T), lambda n, t: (n, 0, t)),
            pl.BlockSpec((1, 1, T), lambda n, t: (n, 0, t)),
            pl.BlockSpec(memory_space=pltpu.MemorySpace.SMEM),
        ],
        out_specs=pl.BlockSpec((1, F_l, T), lambda n, t: (n, 0, t)),
        out_shape=jax.ShapeDtypeStruct((N, F_l, HW), dt),
        compiler_params=cp_par,
        cost_estimate=pl.CostEstimate(
            flops=3 * N * HW * F_l,
            transcendentals=N * HW,
            bytes_accessed=2 * N * HW * F_l * isz + N * HW * 4),
    )(x_r, p, pp)

    return out.reshape(N, F_l, H, W)


attention_block_forward = jax.jit(attention_block_forward)


def _reference(g, x, w_g, b_g, gamma_g, beta_g, w_x, b_x, gamma_x, beta_x,
               w_psi, b_psi, gamma_psi, beta_psi, eps=1e-5):
    """Pure-JAX mirror of the PyTorch forward (NCHW, training-mode BatchNorm)."""
    def conv1x1(z, w, b):
        w2 = w.reshape(w.shape[0], w.shape[1])
        return jnp.einsum('nchw,oc->nohw', z, w2) + b.reshape(1, -1, 1, 1)

    def bn(z, gamma, beta):
        mean = jnp.mean(z, axis=(0, 2, 3), keepdims=True)
        var = jnp.mean((z - mean) ** 2, axis=(0, 2, 3), keepdims=True)
        zh = (z - mean) / jnp.sqrt(var + eps)
        return gamma.reshape(1, -1, 1, 1) * zh + beta.reshape(1, -1, 1, 1)

    g1 = bn(conv1x1(g, w_g, b_g), gamma_g, beta_g)
    x1 = bn(conv1x1(x, w_x, b_x), gamma_x, beta_x)
    s = jnp.maximum(g1 + x1, 0.0)
    psi = jax.nn.sigmoid(bn(conv1x1(s, w_psi, b_psi), gamma_psi, beta_psi))
    return x * psi


if __name__ == "__main__":
    # Small shapes consistent with the module: g:(N,F_g,H,W), x:(N,F_l,H,W), F_int gates.
    N, F_g, F_l, F_int, H, W = 2, 4, 4, 2, 16, 16

    key = jax.random.PRNGKey(0)
    ks = jax.random.split(key, 12)
    g = jax.random.normal(ks[0], (N, F_g, H, W), jnp.float32)
    x = jax.random.normal(ks[1], (N, F_l, H, W), jnp.float32)
    w_g = jax.random.normal(ks[2], (F_int, F_g, 1, 1), jnp.float32) * 0.3
    b_g = jax.random.normal(ks[3], (F_int,), jnp.float32) * 0.1
    w_x = jax.random.normal(ks[4], (F_int, F_l, 1, 1), jnp.float32) * 0.3
    b_x = jax.random.normal(ks[5], (F_int,), jnp.float32) * 0.1
    w_psi = jax.random.normal(ks[6], (1, F_int, 1, 1), jnp.float32) * 0.3
    b_psi = jax.random.normal(ks[7], (1,), jnp.float32) * 0.1
    gamma_g = 1.0 + 0.1 * jax.random.normal(ks[8], (F_int,), jnp.float32)
    beta_g = 0.1 * jax.random.normal(ks[9], (F_int,), jnp.float32)
    gamma_x = 1.0 + 0.1 * jax.random.normal(ks[10], (F_int,), jnp.float32)
    beta_x = 0.1 * jax.random.normal(ks[11], (F_int,), jnp.float32)
    gamma_psi = jnp.full((1,), 1.05, jnp.float32)
    beta_psi = jnp.full((1,), 0.02, jnp.float32)

    out = attention_block_forward(g, x, w_g, b_g, gamma_g, beta_g,
                                  w_x, b_x, gamma_x, beta_x,
                                  w_psi, b_psi, gamma_psi, beta_psi)
    out = jax.block_until_ready(out)

    ref = _reference(g, x, w_g, b_g, gamma_g, beta_g, w_x, b_x, gamma_x, beta_x,
                     w_psi, b_psi, gamma_psi, beta_psi)
    assert out.shape == (N, F_l, H, W), out.shape
    assert jnp.allclose(out, ref, atol=1e-3, rtol=1e-3), float(jnp.max(jnp.abs(out - ref)))

    print("KERNEL_OK")
</pallas_src>

<mosaic_0001>
module attributes {stable_mosaic.version = 11 : i64} {
  func.func @_stats_kernel(%arg0: i32, %arg1: i32, %arg2: memref<1x4x256xf32, #tpu.memory_space<vmem>>, %arg3: memref<1x4x256xf32, #tpu.memory_space<vmem>>, %arg4: memref<2x4xf32, #tpu.memory_space<vmem>>, %arg5: memref<2x4xf32, #tpu.memory_space<vmem>>, %arg6: memref<1x2x4xf32, #tpu.memory_space<vmem>>) attributes {dimension_semantics = [#tpu.dimension_semantics<parallel>, #tpu.dimension_semantics<arbitrary>], iteration_bounds = array<i64: 2, 1>, scalar_prefetch = 0 : i64, scratch_operands = 0 : i64, tpu.core_type = #tpu.core_type<tc>, window_params = [{transform_indices = @transform_0, window_bounds = array<i64: 1, 4, 256>}, {transform_indices = @transform_1, window_bounds = array<i64: 1, 4, 256>}, {pipeline_mode = #tpu.pipeline_mode<synchronous>, transform_indices = @transform_2, window_bounds = array<i64: 2, 4>}, {pipeline_mode = #tpu.pipeline_mode<synchronous>, transform_indices = @transform_3, window_bounds = array<i64: 2, 4>}, {transform_indices = @transform_4, window_bounds = array<i64: 1, 2, 4>}]} {
    %c0_i32 = arith.constant 0 : i32
    %0 = arith.cmpi eq, %arg1, %c0_i32 : i32
    %1 = arith.extui %0 : i1 to i32
    %c0_i32_0 = arith.constant 0 : i32
    %2 = arith.cmpi ne, %1, %c0_i32_0 : i32
    scf.if %2 {
      %cst_21 = arith.constant 0.000000e+00 : f32
      %28 = vector.broadcast %cst_21 : f32 to vector<1x2x4xf32>
      %c0_22 = arith.constant 0 : index
      %c0_23 = arith.constant 0 : index
      %c0_24 = arith.constant 0 : index
      %29 = vector.load %arg6[%c0_22, %c0_23, %c0_24] : memref<1x2x4xf32, #tpu.memory_space<vmem>>, vector<1x2x4xf32>
      tpu.vector_store %arg6[%c0_22, %c0_23, %c0_24], %28 {strides = array<i32>} : memref<1x2x4xf32, #tpu.memory_space<vmem>>, vector<1x2x4xf32>,
    } else {
    }
    %c0 = arith.constant 0 : index
    %c0_1 = arith.constant 0 : index
    %3 = vector.load %arg4[%c0, %c0_1] : memref<2x4xf32, #tpu.memory_space<vmem>>, vector<2x4xf32>
    %c0_2 = arith.constant 0 : index
    %c0_3 = arith.constant 0 : index
    %c0_4 = arith.constant 0 : index
    %4 = vector.load %arg2[%c0_2, %c0_3, %c0_4] : memref<1x4x256xf32, #tpu.memory_space<vmem>>, vector<1x4x256xf32>
    %5 = vector.shape_cast %4 : vector<1x4x256xf32> to vector<4x256xf32>
    %cst = arith.constant dense<0.000000e+00> : vector<2x256xf32>
    %6 = tpu.matmul %3, %5, %cst {dimension_numbers = #tpu.dot_dimension_numbers<[1], [0], [0], [1], [0, 0, 1, 1], [], []>} : vector<2x4xf32>, vector<4x256xf32>, vector<2x256xf32> -> vector<2x256xf32>
    %c0_5 = arith.constant 0 : index
    %c0_6 = arith.constant 0 : index
    %7 = vector.load %arg5[%c0_5, %c0_6] : memref<2x4xf32, #tpu.memory_space<vmem>>, vector<2x4xf32>
    %c0_7 = arith.constant 0 : index
    %c0_8 = arith.constant 0 : index
    %c0_9 = arith.constant 0 : index
    %8 = vector.load %arg3[%c0_7, %c0_8, %c0_9] : memref<1x4x256xf32, #tpu.memory_space<vmem>>, vector<1x4x256xf32>
    %9 = vector.shape_cast %8 : vector<1x4x256xf32> to vector<4x256xf32>
    %cst_10 = arith.constant dense<0.000000e+00> : vector<2x256xf32>
    %10 = tpu.matmul %7, %9, %cst_10 {dimension_numbers = #tpu.dot_dimension_numbers<[1], [0], [0], [1], [0, 0, 1, 1], [], []>} : vector<2x4xf32>, vector<4x256xf32>, vector<2x256xf32> -> vector<2x256xf32>
    %cst_11 = arith.constant dense<0.000000e+00> : vector<2xf32>
    %11 = vector.multi_reduction <add>, %6, %cst_11 [1] : vector<2x256xf32> to vector<2xf32>
    %12 = vector.shape_cast %11 : vector<2xf32> to vector<2x1xf32>
    %13 = arith.mulf %6, %6 : vector<2x256xf32>
    %cst_12 = arith.constant dense<0.000000e+00> : vector<2xf32>
    %14 = vector.multi_reduction <add>, %13, %cst_12 [1] : vector<2x256xf32> to vector<2xf32>
    %15 = vector.shape_cast %14 : vector<2xf32> to vector<2x1xf32>
    %cst_13 = arith.constant dense<0.000000e+00> : vector<2xf32>
    %16 = vector.multi_reduction <add>, %10, %cst_13 [1] : vector<2x256xf32> to vector<2xf32>
    %17 = vector.shape_cast %16 : vector<2xf32> to vector<2x1xf32>
    %18 = arith.mulf %10, %10 : vector<2x256xf32>
    %cst_14 = arith.constant dense<0.000000e+00> : vector<2xf32>
    %19 = vector.multi_reduction <add>, %18, %cst_14 [1] : vector<2x256xf32> to vector<2xf32>
    %20 = vector.shape_cast %19 : vector<2xf32> to vector<2x1xf32>
    %21 = tpu.concatenate %12, %15, %17, %20 in 1 : vector<2x1xf32>, vector<2x1xf32>, vector<2x1xf32>, vector<2x1xf32> -> vector<2x4xf32>
    %c0_15 = arith.constant 0 : index
    %c0_16 = arith.constant 0 : index
    %c0_17 = arith.constant 0 : index
    %22 = vector.load %arg6[%c0_15, %c0_16, %c0_17] : memref<1x2x4xf32, #tpu.memory_space<vmem>>, vector<1x2x4xf32>
    %23 = vector.shape_cast %22 : vector<1x2x4xf32> to vector<2x4xf32>
    %24 = arith.addf %23, %21 : vector<2x4xf32>
    %c0_18 = arith.constant 0 : index
    %c0_19 = arith.constant 0 : index
    %c0_20 = arith.constant 0 : index
    %25 = vector.load %arg6[%c0_18, %c0_19, %c0_20] : memref<1x2x4xf32, #tpu.memory_space<vmem>>, vector<1x2x4xf32>
    %26 = vector.shape_cast %25 : vector<1x2x4xf32> to vector<2x4xf32>
    %27 = vector.shape_cast %24 : vector<2x4xf32> to vector<1x2x4xf32>
    tpu.vector_store %arg6[%c0_18, %c0_19, %c0_20], %27 {strides = array<i32>} : memref<1x2x4xf32, #tpu.memory_space<vmem>>, vector<1x2x4xf32>,
    return
  }
  func.func @transform_0(%arg0: i32, %arg1: i32) -> (i32, i32, i32) {
    %c0_i32 = arith.constant 0 : i32
    %c0_i32_0 = arith.constant 0 : i32
    return %arg0, %c0_i32, %arg1 : i32, i32, i32
  }
  func.func @transform_1(%arg0: i32, %arg1: i32) -> (i32, i32, i32) {
    %c0_i32 = arith.constant 0 : i32
    %c0_i32_0 = arith.constant 0 : i32
    return %arg0, %c0_i32, %arg1 : i32, i32, i32
  }
  func.func @transform_2(%arg0: i32, %arg1: i32) -> (i32, i32) {
    %c0_i32 = arith.constant 0 : i32
    %c0_i32_0 = arith.constant 0 : i32
    %c0_i32_1 = arith.constant 0 : i32
    return %c0_i32, %c0_i32_0 : i32, i32
  }
  func.func @transform_3(%arg0: i32, %arg1: i32) -> (i32, i32) {
    %c0_i32 = arith.constant 0 : i32
    %c0_i32_0 = arith.constant 0 : i32
    %c0_i32_1 = arith.constant 0 : i32
    return %c0_i32, %c0_i32_0 : i32, i32
  }
  func.func @transform_4(%arg0: i32, %arg1: i32) -> (i32, i32, i32) {
    %c0_i32 = arith.constant 0 : i32
    %c0_i32_0 = arith.constant 0 : i32
    %c0_i32_1 = arith.constant 0 : i32
    return %arg0, %c0_i32, %c0_i32_0 : i32, i32, i32
  }
}

module attributes {stable_mosaic.version = 11 : i64} {
  func.func @_fuse_kernel(%arg0: i32, %arg1: i32, %arg2: memref<1x4x256xf32, #tpu.memory_space<vmem>>, %arg3: memref<1x4x256xf32, #tpu.memory_space<vmem>>, %arg4: memref<2x4xf32, #tpu.memory_space<vmem>>, %arg5: memref<2x4xf32, #tpu.memory_space<vmem>>, %arg6: memref<2x1xf32, #tpu.memory_space<vmem>>, %arg7: memref<1x2xf32, #tpu.memory_space<vmem>>, %arg8: memref<1x1x256xf32, #tpu.memory_space<vmem>>, %arg9: memref<1x2x1xf32, #tpu.memory_space<vmem>>) attributes {dimension_semantics = [#tpu.dimension_semantics<parallel>, #tpu.dimension_semantics<arbitrary>], iteration_bounds = array<i64: 2, 1>, scalar_prefetch = 0 : i64, scratch_operands = 0 : i64, tpu.core_type = #tpu.core_type<tc>, window_params = [{transform_indices = @transform_0, window_bounds = array<i64: 1, 4, 256>}, {transform_indices = @transform_1, window_bounds = array<i64: 1, 4, 256>}, {pipeline_mode = #tpu.pipeline_mode<synchronous>, transform_indices = @transform_2, window_bounds = array<i64: 2, 4>}, {pipeline_mode = #tpu.pipeline_mode<synchronous>, transform_indices = @transform_3, window_bounds = array<i64: 2, 4>}, {pipeline_mode = #tpu.pipeline_mode<synchronous>, transform_indices = @transform_4, window_bounds = array<i64: 2, 1>}, {pipeline_mode = #tpu.pipeline_mode<synchronous>, transform_indices = @transform_5, window_bounds = array<i64: 1, 2>}, {transform_indices = @transform_6, window_bounds = array<i64: 1, 1, 256>}, {transform_indices = @transform_7, window_bounds = array<i64: 1, 2, 1>}]} {
    %c0_i32 = arith.constant 0 : i32
    %0 = arith.cmpi eq, %arg1, %c0_i32 : i32
    %1 = arith.extui %0 : i1 to i32
    %c0_i32_0 = arith.constant 0 : i32
    %2 = arith.cmpi ne, %1, %c0_i32_0 : i32
    scf.if %2 {
      %cst_28 = arith.constant 0.000000e+00 : f32
      %34 = vector.broadcast %cst_28 : f32 to vector<1x2x1xf32>
      %c0_29 = arith.constant 0 : index
      %c0_30 = arith.constant 0 : index
      %c0_31 = arith.constant 0 : index
      %35 = vector.load %arg9[%c0_29, %c0_30, %c0_31] : memref<1x2x1xf32, #tpu.memory_space<vmem>>, vector<1x2x1xf32>
      tpu.vector_store %arg9[%c0_29, %c0_30, %c0_31], %34 {strides = array<i32>} : memref<1x2x1xf32, #tpu.memory_space<vmem>>, vector<1x2x1xf32>,
    } else {
    }
    %c0 = arith.constant 0 : index
    %c0_1 = arith.constant 0 : index
    %3 = vector.load %arg4[%c0, %c0_1] : memref<2x4xf32, #tpu.memory_space<vmem>>, vector<2x4xf32>
    %c0_2 = arith.constant 0 : index
    %c0_3 = arith.constant 0 : index
    %c0_4 = arith.constant 0 : index
    %4 = vector.load %arg2[%c0_2, %c0_3, %c0_4] : memref<1x4x256xf32, #tpu.memory_space<vmem>>, vector<1x4x256xf32>
    %5 = vector.shape_cast %4 : vector<1x4x256xf32> to vector<4x256xf32>
    %cst = arith.constant dense<0.000000e+00> : vector<2x256xf32>
    %6 = tpu.matmul %3, %5, %cst {dimension_numbers = #tpu.dot_dimension_numbers<[1], [0], [0], [1], [0, 0, 1, 1], [], []>} : vector<2x4xf32>, vector<4x256xf32>, vector<2x256xf32> -> vector<2x256xf32>
    %c0_5 = arith.constant 0 : index
    %c0_6 = arith.constant 0 : index
    %7 = vector.load %arg5[%c0_5, %c0_6] : memref<2x4xf32, #tpu.memory_space<vmem>>, vector<2x4xf32>
    %c0_7 = arith.constant 0 : index
    %c0_8 = arith.constant 0 : index
    %c0_9 = arith.constant 0 : index
    %8 = vector.load %arg3[%c0_7, %c0_8, %c0_9] : memref<1x4x256xf32, #tpu.memory_space<vmem>>, vector<1x4x256xf32>
    %9 = vector.shape_cast %8 : vector<1x4x256xf32> to vector<4x256xf32>
    %cst_10 = arith.constant dense<0.000000e+00> : vector<2x256xf32>
    %10 = tpu.matmul %7, %9, %cst_10 {dimension_numbers = #tpu.dot_dimension_numbers<[1], [0], [0], [1], [0, 0, 1, 1], [], []>} : vector<2x4xf32>, vector<4x256xf32>, vector<2x256xf32> -> vector<2x256xf32>
    %11 = arith.addf %6, %10 : vector<2x256xf32>
    %c0_11 = arith.constant 0 : index
    %c0_12 = arith.constant 0 : index
    %12 = vector.load %arg6[%c0_11, %c0_12] : memref<2x1xf32, #tpu.memory_space<vmem>>, vector<2x1xf32>
    %13 = vector.broadcast %12 : vector<2x1xf32> to vector<2x256xf32>
    %14 = arith.addf %11, %13 : vector<2x256xf32>
    %cst_13 = arith.constant 0.000000e+00 : f32
    %15 = vector.broadcast %cst_13 : f32 to vector<2x256xf32>
    %16 = arith.maximumf %14, %15 : vector<2x256xf32>
    %c0_14 = arith.constant 0 : index
    %c0_15 = arith.constant 0 : index
    %17 = vector.load %arg7[%c0_14, %c0_15] : memref<1x2xf32, #tpu.memory_space<vmem>>, vector<1x2xf32>
    %cst_16 = arith.constant dense<0.000000e+00> : vector<1x256xf32>
    %18 = tpu.matmul %17, %16, %cst_16 {dimension_numbers = #tpu.dot_dimension_numbers<[1], [0], [0], [1], [0, 0, 1, 1], [], []>} : vector<1x2xf32>, vector<2x256xf32>, vector<1x256xf32> -> vector<1x256xf32>
    %c0_17 = arith.constant 0 : index
    %c0_18 = arith.constant 0 : index
    %c0_19 = arith.constant 0 : index
    %19 = vector.load %arg8[%c0_17, %c0_18, %c0_19] : memref<1x1x256xf32, #tpu.memory_space<vmem>>, vector<1x1x256xf32>
    %20 = vector.shape_cast %19 : vector<1x1x256xf32> to vector<1x256xf32>
    %21 = vector.shape_cast %18 : vector<1x256xf32> to vector<1x1x256xf32>
    tpu.vector_store %arg8[%c0_17, %c0_18, %c0_19], %21 {strides = array<i32>} : memref<1x1x256xf32, #tpu.memory_space<vmem>>, vector<1x1x256xf32>,
    %cst_20 = arith.constant dense<0.000000e+00> : vector<1xf32>
    %22 = vector.multi_reduction <add>, %18, %cst_20 [1] : vector<1x256xf32> to vector<1xf32>
    %23 = vector.shape_cast %22 : vector<1xf32> to vector<1x1xf32>
    %24 = arith.mulf %18, %18 : vector<1x256xf32>
    %cst_21 = arith.constant dense<0.000000e+00> : vector<1xf32>
    %25 = vector.multi_reduction <add>, %24, %cst_21 [1] : vector<1x256xf32> to vector<1xf32>
    %26 = vector.shape_cast %25 : vector<1xf32> to vector<1x1xf32>
    %27 = tpu.concatenate %23, %26 in 0 : vector<1x1xf32>, vector<1x1xf32> -> vector<2x1xf32>
    %c0_22 = arith.constant 0 : index
    %c0_23 = arith.constant 0 : index
    %c0_24 = arith.constant 0 : index
    %28 = vector.load %arg9[%c0_22, %c0_23, %c0_24] : memref<1x2x1xf32, #tpu.memory_space<vmem>>, vector<1x2x1xf32>
    %29 = vector.shape_cast %28 : vector<1x2x1xf32> to vector<2x1xf32>
    %30 = arith.addf %29, %27 : vector<2x1xf32>
    %c0_25 = arith.constant 0 : index
    %c0_26 = arith.constant 0 : index
    %c0_27 = arith.constant 0 : index
    %31 = vector.load %arg9[%c0_25, %c0_26, %c0_27] : memref<1x2x1xf32, #tpu.memory_space<vmem>>, vector<1x2x1xf32>
    %32 = vector.shape_cast %31 : vector<1x2x1xf32> to vector<2x1xf32>
    %33 = vector.shape_cast %30 : vector<2x1xf32> to vector<1x2x1xf32>
    tpu.vector_store %arg9[%c0_25, %c0_26, %c0_27], %33 {strides = array<i32>} : memref<1x2x1xf32, #tpu.memory_space<vmem>>, vector<1x2x1xf32>,
    return
  }
  func.func @transform_0(%arg0: i32, %arg1: i32) -> (i32, i32, i32) {
    %c0_i32 = arith.constant 0 : i32
    %c0_i32_0 = arith.constant 0 : i32
    return %arg0, %c0_i32, %arg1 : i32, i32, i32
  }
  func.func @transform_1(%arg0: i32, %arg1: i32) -> (i32, i32, i32) {
    %c0_i32 = arith.constant 0 : i32
    %c0_i32_0 = arith.constant 0 : i32
    return %arg0, %c0_i32, %arg1 : i32, i32, i32
  }
  func.func @transform_2(%arg0: i32, %arg1: i32) -> (i32, i32) {
    %c0_i32 = arith.constant 0 : i32
    %c0_i32_0 = arith.constant 0 : i32
    %c0_i32_1 = arith.constant 0 : i32
    return %c0_i32, %c0_i32_0 : i32, i32
  }
  func.func @transform_3(%arg0: i32, %arg1: i32) -> (i32, i32) {
    %c0_i32 = arith.constant 0 : i32
    %c0_i32_0 = arith.constant 0 : i32
    %c0_i32_1 = arith.constant 0 : i32
    return %c0_i32, %c0_i32_0 : i32, i32
  }
  func.func @transform_4(%arg0: i32, %arg1: i32) -> (i32, i32) {
    %c0_i32 = arith.constant 0 : i32
    %c0_i32_0 = arith.constant 0 : i32
    %c0_i32_1 = arith.constant 0 : i32
    return %c0_i32, %c0_i32_0 : i32, i32
  }
  func.func @transform_5(%arg0: i32, %arg1: i32) -> (i32, i32) {
    %c0_i32 = arith.constant 0 : i32
    %c0_i32_0 = arith.constant 0 : i32
    %c0_i32_1 = arith.constant 0 : i32
    return %c0_i32, %c0_i32_0 : i32, i32
  }
  func.func @transform_6(%arg0: i32, %arg1: i32) -> (i32, i32, i32) {
    %c0_i32 = arith.constant 0 : i32
    %c0_i32_0 = arith.constant 0 : i32
    return %arg0, %c0_i32, %arg1 : i32, i32, i32
  }
  func.func @transform_7(%arg0: i32, %arg1: i32) -> (i32, i32, i32) {
    %c0_i32 = arith.constant 0 : i32
    %c0_i32_0 = arith.constant 0 : i32
    %c0_i32_1 = arith.constant 0 : i32
    return %arg0, %c0_i32, %c0_i32_0 : i32, i32, i32
  }
}

module attributes {stable_mosaic.version = 11 : i64} {
  func.func @_gate_kernel(%arg0: i32, %arg1: i32, %arg2: memref<1x4x256xf32, #tpu.memory_space<vmem>>, %arg3: memref<1x1x256xf32, #tpu.memory_space<vmem>>, %arg4: memref<2xf32, #tpu.memory_space<smem>>, %arg5: memref<1x4x256xf32, #tpu.memory_space<vmem>>) attributes {dimension_semantics = [#tpu.dimension_semantics<parallel>, #tpu.dimension_semantics<parallel>], iteration_bounds = array<i64: 2, 1>, scalar_prefetch = 0 : i64, scratch_operands = 0 : i64, tpu.core_type = #tpu.core_type<tc>, window_params = [{transform_indices = @transform_0, window_bounds = array<i64: 1, 4, 256>}, {transform_indices = @transform_1, window_bounds = array<i64: 1, 1, 256>}, {transform_indices = @transform_2, window_bounds = array<i64: 2>}, {transform_indices = @transform_3, window_bounds = array<i64: 1, 4, 256>}]} {
    %c0 = arith.constant 0 : index
    %0 = memref.load %arg4[%c0] : memref<2xf32, #tpu.memory_space<smem>>
    %c0_0 = arith.constant 0 : index
    %c0_1 = arith.constant 0 : index
    %c0_2 = arith.constant 0 : index
    %1 = vector.load %arg3[%c0_0, %c0_1, %c0_2] : memref<1x1x256xf32, #tpu.memory_space<vmem>>, vector<1x1x256xf32>
    %2 = vector.shape_cast %1 : vector<1x1x256xf32> to vector<1x256xf32>
    %3 = vector.broadcast %0 : f32 to vector<1x256xf32>
    %4 = arith.mulf %3, %2 : vector<1x256xf32>
    %c1 = arith.constant 1 : index
    %5 = memref.load %arg4[%c1] : memref<2xf32, #tpu.memory_space<smem>>
    %6 = vector.broadcast %5 : f32 to vector<1x256xf32>
    %7 = arith.addf %4, %6 : vector<1x256xf32>
    %8 = arith.negf %7 : vector<1x256xf32>
    %9 = math.exp %8 : vector<1x256xf32>
    %cst = arith.constant 1.000000e+00 : f32
    %10 = vector.broadcast %cst : f32 to vector<1x256xf32>
    %11 = arith.addf %10, %9 : vector<1x256xf32>
    %12 = arith.divf %10, %11 : vector<1x256xf32>
    %c0_3 = arith.constant 0 : index
    %c0_4 = arith.constant 0 : index
    %c0_5 = arith.constant 0 : index
    %13 = vector.load %arg2[%c0_3, %c0_4, %c0_5] : memref<1x4x256xf32, #tpu.memory_space<vmem>>, vector<1x4x256xf32>
    %14 = vector.shape_cast %13 : vector<1x4x256xf32> to vector<4x256xf32>
    %15 = vector.broadcast %12 : vector<1x256xf32> to vector<4x256xf32>
    %16 = arith.mulf %14, %15 : vector<4x256xf32>
    %c0_6 = arith.constant 0 : index
    %c0_7 = arith.constant 0 : index
    %c0_8 = arith.constant 0 : index
    %17 = vector.load %arg5[%c0_6, %c0_7, %c0_8] : memref<1x4x256xf32, #tpu.memory_space<vmem>>, vector<1x4x256xf32>
    %18 = vector.shape_cast %17 : vector<1x4x256xf32> to vector<4x256xf32>
    %19 = vector.shape_cast %16 : vector<4x256xf32> to vector<1x4x256xf32>
    tpu.vector_store %arg5[%c0_6, %c0_7, %c0_8], %19 {strides = array<i32>} : memref<1x4x256xf32, #tpu.memory_space<vmem>>, vector<1x4x256xf32>,
    return
  }
  func.func @transform_0(%arg0: i32, %arg1: i32) -> (i32, i32, i32) {
    %c0_i32 = arith.constant 0 : i32
    %c0_i32_0 = arith.constant 0 : i32
    return %arg0, %c0_i32, %arg1 : i32, i32, i32
  }
  func.func @transform_1(%arg0: i32, %arg1: i32) -> (i32, i32, i32) {
    %c0_i32 = arith.constant 0 : i32
    %c0_i32_0 = arith.constant 0 : i32
    return %arg0, %c0_i32, %arg1 : i32, i32, i32
  }
  func.func @transform_2(%arg0: i32, %arg1: i32) -> i32 {
    %c0_i32 = arith.constant 0 : i32
    %c0_i32_0 = arith.constant 0 : i32
    return %c0_i32 : i32
  }
  func.func @transform_3(%arg0: i32, %arg1: i32) -> (i32, i32, i32) {
    %c0_i32 = arith.constant 0 : i32
    %c0_i32_0 = arith.constant 0 : i32
    return %arg0, %c0_i32, %arg1 : i32, i32, i32
  }
}

</mosaic_0001>

<bundles_post_ra>
// kernel: attention_block_forward.3
= control target key start
LH: loop header
LB: loop body
LE: loop exit
PB: predicated region body
PF: predicated region fallthrough
CT: control target
= control target key end

     0   :  { %s649_s15 = smov 0   ;;  %s651_s16 = smov 0   ;;  %s706_s0 = inlined_call_operand.vmem [shape: f32[2,4,256], index: 0, kind: input, shape index: {}]   ;;  %s707_s1 = inlined_call_operand.vmem [shape: f32[2,4,256], index: 1, kind: input, shape index: {}]   ;;  %s708_s2 = inlined_call_operand.vmem [shape: f32[2,4], index: 2, kind: input, shape index: {}]   ;;  %s709_s3 = inlined_call_operand.vmem [shape: f32[2,4], index: 3, kind: input, shape index: {}]   ;;  %s710_s4 = inlined_call_operand.vmem [shape: f32[2,2,4], index: 4, kind: output, shape index: {}]  }
   0x1   :  { %s653_s17 = smov 0  }
   0x2 LB: > { %s26_s18 = sadd.s32 1, %s617_s16  ;;  %p556_p0 = scmp.ge.s32.totalorder %s621_s17, 1  ;;  %s621_s17 = sphi %s653_s17, %s14_s17   ;;  %s617_s16 = sphi %s651_s16, %s712_s16   ;;  %s613_s15 = sphi %s649_s15, %s711_s15  }
   0x3   : > { %p28_p1 = scmp.ge.s32.totalorder %s26_s18, 2  ;;  %p198_p2 = scmp.lt.s32.totalorder %s621_s17, 3 }
   0x5   : > { %s714_s18 = smov (%p28_p1, %s26_s18), 0  ;;  %p199_p3 = pnand %p556_p0, %p198_p2 }
   0x6   : > { %p237_p4 = scmp.lt.s32.totalorder (!%p199_p3), %s613_s15, 1 }
   0x7   : > { %202 = sbr.rel (%p199_p3) target bundleno = 366 (0x16e), region = 36 }
   0xc   : > { %v623_v0 = vmov 0.0   ;;  %s716_s15 = smov (!%p237_p4, %s613_s15), 1  ;;  %vm264_vm0 = vcmask 25600   ;;  %vm274_vm1 = vcmask 1043456   ;;  %v266_v5 = vld [vmem:[%s708_s2] sm:$0x3] }
   0xd   : > { %343 = vmatprep.mubr.f32.mxu0 %v623_v0  ;;  %425 = vmatprep.mubr.f32.mxu1 %v623_v0  ;;  %s570_s19 = sshll.u32 %s716_s15, 3  ;;  %s561_s20 = sshll.u32 %s716_s15, 1  ;;  %vm270_vm2 = vcmask 31744   ;;  %v350_v6 = vld [vmem:[%s709_s3] sm:$0x3]  ;;  %vm432_vm3 = vcmask 1041408  }
   0xe   : > { %s244_s23 = scalar_lea.vmem %s706_s0, %s570_s19  ;;  %s254_s26 = scalar_lea.vmem %s707_s1, %s570_s19  ;;  %vm457_vm4 = vcmask 7168   ;;  %vm459_vm5 = vcmask 15360   ;;  %vm461_vm6 = vcmask 23552  }
   0xf   : > { %v267_v1 = vld [vmem:[%s244_s23] sm:$0xff]  ;;  %s676_s29 = scalar_lea.vmem %s710_s4, %s561_s20 }
  0x10   : > { %v351_v2 = vld [vmem:[%s254_s26] sm:$0xff]  ;;  %v269_v3 = vcombine.high %v267_v1, %v267_v1  ;;  %265 = vst.msk [vmem:[%s676_s29] sm:$0x3] %vm264_vm0, %v623_v0 }
  0x11   : > { %v353_v4 = vcombine.high %v351_v2, %v351_v2 }
  0x12   : > { %562 = vmatprep.subr.msk.mxu0 %vm274_vm1, %v269_v3 }
  0x13   : > { %565 = vmatprep.subr.msk.mxu1 %vm274_vm1, %v353_v4  ;;  %563 = vmatpush1.msk.msra.mxu0 %vm274_vm1, %v267_v1 }
  0x14   : > { %566 = vmatpush1.msk.msra.mxu1 %vm274_vm1, %v351_v2  ;;  %564 = vmatmul.mubr.msk.f32.vlgmr.msra.gmra.mxu0 %vm270_vm2, %v266_v5 }
  0x15   : > { %567 = vmatmul.mubr.msk.f32.vlgmr.msra.gmra.mxu1 %vm270_vm2, %v350_v6 }
  0x17   : > { %v463_v30 = vld [vmem:[%s676_s29] sm:$0x3] }
  0xd4   : > { %v345_v7 = vpop.f32.mrf.mxu0 }
  0xd5   : > { %v427_v8 = vpop.f32.mrf.mxu1  ;;  %v438_v11 = vmul.f32 %v345_v7, %v345_v7  ;;  %v433_v14 = vsel %vm432_vm3, %v345_v7, 0.0 }
  0xd6   : > { %v450_v9 = vmul.f32 %v427_v8, %v427_v8  ;;  %v445_v10 = vsel %vm432_vm3, %v427_v8, 0.0  ;;  %v347_v12 = vpop.f32.mrf.mxu0 }
  0xd7   : > { %v429_v13 = vpop.f32.mrf.mxu1  ;;  %v434_v15 = vsel %vm432_vm3, %v347_v12, 0.0  ;;  %v439_v16 = vmul.f32 %v347_v12, %v347_v12  ;;  %v440_v24 = vsel %vm432_vm3, %v438_v11, 0.0 }
  0xd8   : > { %v446_v17 = vsel %vm432_vm3, %v429_v13, 0.0  ;;  %v451_v18 = vmul.f32 %v429_v13, %v429_v13  ;;  %v435_v20 = vadd.f32 %v434_v15, %v433_v14  ;;  %v452_v21 = vsel %vm432_vm3, %v450_v9, 0.0 }
  0xd9   : > { %v447_v19 = vadd.f32 %v446_v17, %v445_v10  ;;  %v441_v23 = vsel %vm432_vm3, %v439_v16, 0.0 }
  0xda   : > { %v453_v22 = vsel %vm432_vm3, %v451_v18, 0.0  ;;  %436 = vadd.xlane.f32.xlu0 %v435_v20  ;;  %v442_v26 = vadd.f32 %v441_v23, %v440_v24 }
  0xdb   : > { %448 = vadd.xlane.f32.xlu1 %v447_v19  ;;  %v454_v25 = vadd.f32 %v453_v22, %v452_v21 }
  0xde   : > { %443 = vadd.xlane.f32.xlu0 %v442_v26 }
  0xdf   : > { %455 = vadd.xlane.f32.xlu1 %v454_v25 }
 0x163   : > { %v437_v28 = vpop.xlane.xlu0 %436 }
 0x164   : > { %v449_v27 = vpop.xlane.xlu1 %448 }
 0x167   : > { %v444_v29 = vpop.xlane.xlu0 %443 }
 0x168   : > { %v458_v31 = vsel %vm457_vm4, %v437_v28, %v444_v29  ;;  %v456_v32 = vpop.xlane.xlu1 %455 }
 0x169   : > { %v460_v33 = vsel %vm459_vm5, %v458_v31, %v449_v27 }
 0x16a   : > { %v462_v34 = vsel %vm461_vm6, %v460_v33, %v456_v32 }
 0x16b   : > { %v464_v35 = vadd.f32 %v463_v30, %v462_v34 }
 0x16d   : > { %466 = vst.msk [vmem:[%s676_s29] sm:$0x3] %vm264_vm0, %v464_v35 }
 0x16e PF: > { %s14_s17 = sadd.s32 1, %s621_s17   ;;  %s711_s15 = smov %s617_s16 }
 0x16f   : > { %p11_p5 = scmp.ge.s32.totalorder %s14_s17, 4   ;;  %s712_s16 = smov %s714_s18 }
 0x171   :  { %13 = sbr.rel (!%p11_p5) target bundleno = 2 (0x2), region = 73 }

// kernel: attention_block_forward.5
= control target key start
LH: loop header
LB: loop body
LE: loop exit
PB: predicated region body
PF: predicated region fallthrough
CT: control target
= control target key end

     0   :  { %8 = vsyncpa [#allocation3], 0  ;;  %s519_s12 = smov 0   ;;  %s521_s13 = smov 0   ;;  %s581_s0 = inlined_call_operand.vmem [shape: f32[2,4,256], index: 0, kind: input, shape index: {}]   ;;  %s582_s1 = inlined_call_operand.vmem [shape: f32[2,1,256], index: 1, kind: input, shape index: {}]   ;;  %s583_s2 = inlined_call_operand.vmem [shape: f32[2], index: 2, kind: input, shape index: {}]   ;;  %s584_s3 = inlined_call_operand.vmem [shape: f32[2,4,256], index: 3, kind: output, shape index: {}]  }
   0x1   :  { %s523_s14 = smov 0  }
   0x2 LB: > { %s398_s15 = sadd.s32 4294967295, %s496_s14   ;;  %s26_s16 = sadd.s32 1, %s492_s13  ;;  %s496_s14 = sphi %s523_s14, %s14_s14   ;;  %s492_s13 = sphi %s521_s13, %s588_s13   ;;  %s488_s12 = sphi %s519_s12, %s587_s12  }
   0x3   : > { %p28_p0 = scmp.ge.s32.totalorder %s26_s16, 2  ;;  %p400_p1 = scmp.ge.s32.totalorder %s496_s14, 1 }
   0x4   : > { %p136_p2 = scmp.lt.s32.totalorder %s496_s14, 3  ;;  %p544_p4 = scmp.eq.s32.totalorder %s398_s15, 0 }
   0x5   : > { %s590_s16 = smov (%p28_p0, %s26_s16), 0  ;;  %s149_s21 = sshll.u32 %s583_s2, 4  ;;  %s150_s21 = int_to_ptr.vmem [resolvable:$true] %s149_s21 }
   0x6   : > { %p540_p3 = pnand %p400_p1, %p136_p2  ;;  %s455_s22 = scalar_lea.vmem %s150_s21, 16 }
   0x7   : > { %p456_p7 = scmp.ne.s32.totalorder %s150_s21, %s455_s22  ;;  %p463_p11 = scmp.lt.s32.totalorder %s150_s21, %s150_s21 }
   0x8   : > { %p420_p5 = pneg %p540_p3  ;;  %p464_p12 = scmp.lt.s32.totalorder %s455_s22, %s455_s22 }
   0xa   : > { %p421_p6 = pnand %p544_p4, %p420_p5  ;;  %p465_p13 = por %p464_p12, %p463_p11 }
   0xc   : > { %p457_p8 = pneg %p421_p6 }
   0xe   : > { %p458_p9 = pnand %p457_p8, %p456_p7 }
  0x10   : > { %p459_p10 = pneg %p458_p9 }
  0x12   : > { %p466_p0 = pnand %p465_p13, %p459_p10 }
  0x14   : > { %469 = shalt.err (!%p466_p0)
}
  0x15   : > { %s498_s23 = smov [#allocation2]   ;;  %187 = sbr.rel (%p540_p3) target bundleno = 79 (0x4f), region = 32 }
  0x16   : > { %423 = dma.vmem_to_smem (!%p421_p6), %s150_s21, 16, %s498_s23, [#allocation3]  }
  0x1a   : > { %483 = dma.done.wait (%p544_p4), [#allocation3], 16  }
  0x1b   : > { %485 = vsyncadd (%p544_p4), [#allocation3], 4294967280 }
  0x1c   : > { %193 = sfence }
  0x1d   : > { %p229_p1 = scmp.lt.s32.totalorder %s488_s12, 1  ;;  %s257_s24 = sld [smem:[#allocation2]]  ;;  %v272_v8 = vlaneseq }
  0x1e   : > { %s410_s25 = sld [smem:[#allocation2 + $0x1]] }
  0x1f   : > { %s592_s12 = smov (!%p229_p1, %s488_s12), 1  ;;  %v273_v9 = vshrl.u32 %v272_v8, 7 }
  0x20   : > { %s407_s26 = sshll.u32 %s592_s12, 1  ;;  %s414_s30 = sshll.u32 %s592_s12, 3 }
  0x21   : > { %s245_s29 = scalar_lea.vmem %s582_s1, %s407_s26  ;;  %v274_v10 = vsub.s32 0, %v273_v9  ;;  %v278_v11 = vsub.s32 1, %v273_v9  ;;  %s236_s6 = scalar_lea.vmem %s581_s0, %s414_s30 }
  0x22   : > { %v258_v0 = vld [vmem:[%s245_s29] sm:$0x3]  ;;  %s255_s9 = scalar_lea.vmem %s584_s3, %s414_s30 }
  0x23   : > { %v259_v1 = vstv %s257_s24  ;;  %v270_v15 = vld [vmem:[%s236_s6] sm:$0xff] }
  0x24   : > { %v260_v2 = vmul.f32 %v259_v1, %v258_v0  ;;  %v262_v3 = vstv %s410_s25 }
  0x26   : > { %v263_v4 = vadd.f32 %v262_v3, %v260_v2 }
  0x28   : > { %v411_v5 = vmul.f32 -1.442695, %v263_v4 }
  0x2a   : > { %451 = vpow2.f32 %v411_v5 }
  0x37   : > { %v452_v6 = vpop.eup %451 }
  0x38   : > { %v267_v7 = vadd.f32 1.0, %v452_v6 }
  0x3a   : > { %453 = vrcp.f32 %v267_v7 }
  0x47   : > { %v454_v12 = vpop.eup %453 }
  0x48   : > { %v275_v13 = vrot.slane %v454_v12, %v274_v10  ;;  %v279_v14 = vrot.slane %v454_v12, %v278_v11 }
  0x4a   : > { %v280_v16 = vcombine.low %v275_v13, %v279_v14 }
  0x4c   : > { %v282_v17 = vmul.f32 %v280_v16, %v270_v15 }
  0x4e   : > { %283 = vst [vmem:[%s255_s9] sm:$0xff] %v282_v17 }
  0x4f PF: > { %s14_s14 = sadd.s32 1, %s496_s14   ;;  %s587_s12 = smov %s492_s13 }
  0x50   : > { %p11_p2 = scmp.ge.s32.totalorder %s14_s14, 4   ;;  %s588_s13 = smov %s590_s16 }
  0x52   :  { %13 = sbr.rel (!%p11_p2) target bundleno = 2 (0x2), region = 70 }
  0x57   :  { %314 = vsyncpa [#allocation3], 1 }
  0x58   :  { %316 = vsyncpa [#allocation3 + $0x1], 1 }

// kernel: attention_block_forward.4
= control target key start
LH: loop header
LB: loop body
LE: loop exit
PB: predicated region body
PF: predicated region fallthrough
CT: control target
= control target key end

     0   :  { %s923_s24 = smov 0   ;;  %s925_s25 = smov 0   ;;  %s994_s0 = inlined_call_operand.vmem [shape: f32[2,4,256], index: 0, kind: input, shape index: {}]   ;;  %s995_s1 = inlined_call_operand.vmem [shape: f32[2,4,256], index: 1, kind: input, shape index: {}]   ;;  %s996_s2 = inlined_call_operand.vmem [shape: f32[2,4], index: 2, kind: input, shape index: {}]   ;;  %s997_s3 = inlined_call_operand.vmem [shape: f32[2,4], index: 3, kind: input, shape index: {}]   ;;  %s998_s4 = inlined_call_operand.vmem [shape: f32[2,1], index: 4, kind: input, shape index: {}]   ;;  %s999_s5 = inlined_call_operand.vmem [shape: f32[1,2], index: 5, kind: input, shape index: {}]   ;;  %s1000_s6 = inlined_call_operand.vmem [shape: f32[2,1,256], index: 6, kind: output, shape index: {0}]   ;;  %s1001_s7 = inlined_call_operand.vmem [shape: f32[2,2,1], index: 7, kind: output, shape index: {1}]  }
   0x1   :  { %s927_s26 = smov 0  }
   0x2 LB: > { %s30_s27 = sadd.s32 1, %s874_s25  ;;  %p806_p0 = scmp.ge.s32.totalorder %s878_s26, 1  ;;  %s878_s26 = sphi %s927_s26, %s18_s26   ;;  %s874_s25 = sphi %s925_s25, %s1003_s25   ;;  %s870_s24 = sphi %s923_s24, %s1002_s24  }
   0x3   : > { %p32_p1 = scmp.ge.s32.totalorder %s30_s27, 2  ;;  %p278_p2 = scmp.lt.s32.totalorder %s878_s26, 3 }
   0x5   : > { %s1005_s27 = smov (%p32_p1, %s30_s27), 0  ;;  %p279_p3 = pnand %p806_p0, %p278_p2 }
   0x6   : > { %p331_p4 = scmp.lt.s32.totalorder (!%p279_p3), %s870_s24, 1 }
   0x7   : > { %282 = sbr.rel (%p279_p3) target bundleno = 568 (0x238), region = 44 }
   0xc   : > { %v880_v0 = vmov 0.0   ;;  %v535_v1 = vld [vmem:[%s998_s4] sm:$0x3]  ;;  %s1007_s24 = smov (!%p331_p4, %s870_s24), 1  ;;  %v881_v2 = vmov 0   ;;  %vm367_vm0 = vcmask 1024   ;;  %v634_v23 = vlaneseq }
   0xd   : > { %448 = vmatprep.mubr.f32.mxu0 %v880_v0  ;;  %528 = vmatprep.mubr.f32.mxu1 %v880_v0  ;;  %s824_s30 = sshll.u32 %s1007_s24, 3  ;;  %s811_s11 = sshll.u32 %s1007_s24, 1  ;;  %vm379_vm1 = vcmask 1043456   ;;  %v371_v7 = vld [vmem:[%s997_s3] sm:$0x3]  ;;  %vm375_vm2 = vcmask 31744  }
   0xe   : > { %853 = vset.pattern.permute.xlu0 %v881_v2  ;;  %s348_s10 = scalar_lea.vmem %s995_s1, %s824_s30  ;;  %s956_s14 = scalar_lea.vmem %s1001_s7, %s811_s11  ;;  %v369_v8 = vld [vmem:[%s996_s2] sm:$0x3]  ;;  %vm550_vm3 = vcmask 1041408   ;;  %vm546_vm4 = vcmask 15360   ;;  %v882_v21 = vmov 1966171168  }
   0xf   : > { %538 = vperm.xlu0 %853, %v535_v1   ;;  %v372_v3 = vld [vmem:[%s348_s10] sm:$0xff]  ;;  %s338_s17 = scalar_lea.vmem %s994_s0, %s824_s30  ;;  %368 = vst.msk [vmem:[%s956_s14] sm:$0x3] %vm367_vm0, %v880_v0  ;;  %v632_v22 = vunpack.c.l.s4 %v882_v21  ;;  %v635_v25 = vshrl.u32 %v634_v23, 7  ;;  %vm651_vm5 = vcmask 1040384   ;;  %s357_s30 = scalar_lea.vmem %s1000_s6, %s811_s11  ;;  %vm648_vm6 = vcmp.lt.s32.totalorder %v634_v23, 256 }
  0x10   : > { %v374_v4 = vcombine.high %v372_v3, %v372_v3  ;;  %v370_v5 = vld [vmem:[%s338_s17] sm:$0xff] }
  0x11   : > { %v456_v6 = vcombine.high %v370_v5, %v370_v5  ;;  %v545_v20 = vld [vmem:[%s999_s5] sm:$0x1]  ;;  %v633_v24 = vunpack.c.0.s8 %v632_v22 }
  0x12   : > { %813 = vmatprep.subr.msk.mxu0 %vm379_vm1, %v374_v4 }
  0x13   : > { %816 = vmatprep.subr.msk.mxu1 %vm379_vm1, %v456_v6  ;;  %814 = vmatpush1.msk.msra.mxu0 %vm379_vm1, %v372_v3  ;;  %v636_v28 = vsub.s32 %v633_v24, %v635_v25 }
  0x14   : > { %817 = vmatpush1.msk.msra.mxu1 %vm379_vm1, %v370_v5  ;;  %815 = vmatmul.mubr.msk.f32.vlgmr.msra.gmra.mxu0 %vm375_vm2, %v371_v7 }
  0x15   : > { %818 = vmatmul.mubr.msk.f32.vlgmr.msra.gmra.mxu1 %vm375_vm2, %v369_v8  ;;  %621 = vmatprep.mubr.f32.mxu0 %v880_v0 }
  0x16   : > { %v668_v41 = vld [vmem:[%s956_s14] sm:$0x3] }
  0x8a   : > { %v539_v12 = vpop.permute.xlu0 %538 }
  0xd4   : > { %v450_v9 = vpop.f32.mrf.mxu0 }
  0xd5   : > { %v530_v10 = vpop.f32.mrf.mxu1 }
  0xd6   : > { %v531_v11 = vadd.f32 %v530_v10, %v450_v9  ;;  %v452_v13 = vpop.f32.mrf.mxu0 }
  0xd7   : > { %v532_v14 = vpop.f32.mrf.mxu1 }
  0xd8   : > { %v533_v15 = vadd.f32 %v532_v14, %v452_v13  ;;  %v541_v16 = vadd.f32 %v539_v12, %v531_v11 }
  0xda   : > { %v542_v17 = vadd.f32 %v539_v12, %v533_v15  ;;  %v543_v19 = vmax.f32 %v541_v16, 0.0 }
  0xdc   : > { %v544_v18 = vmax.f32 %v542_v17, 0.0 }
  0xde   : > { %819 = vmatprep.subr.msk.mxu0 %vm550_vm3, %v544_v18 }
  0xdf   : > { %820 = vmatpush1.msk.msra.mxu0 %vm550_vm3, %v543_v19 }
  0xe0   : > { %821 = vmatmul.mubr.msk.f32.vlgmr.msra.gmra.mxu0 %vm546_vm4, %v545_v20 }
 0x1a0   : > { %v623_v26 = vpop.f32.mrf.mxu0 }
 0x1a1   : > { %v657_v27 = vmul.f32 %v623_v26, %v623_v26  ;;  %v652_v32 = vsel %vm651_vm5, %v623_v26, 0.0 }
 0x1a2   : > { %v625_v29 = vpop.f32.mrf.mxu0 }
 0x1a3   : > { %v630_v30 = vcombine.low %v623_v26, %v625_v29  ;;  %v658_v31 = vmul.f32 %v625_v29, %v625_v29  ;;  %v653_v33 = vsel %vm651_vm5, %v625_v29, 0.0  ;;  %v659_v36 = vsel %vm651_vm5, %v657_v27, 0.0 }
 0x1a4   : > { %v654_v34 = vadd.f32 %v653_v33, %v652_v32 }
 0x1a5   : > { %v637_v35 = vrot.slane %v630_v30, %v636_v28  ;;  %v660_v37 = vsel %vm651_vm5, %v658_v31, 0.0 }
 0x1a6   : > { %655 = vadd.xlane.f32.xlu1 %v654_v34  ;;  %v661_v38 = vadd.f32 %v660_v37, %v659_v36 }
 0x1a7   : > { %v644_v39 = vrot.slane %v637_v35, %v636_v28 }
 0x1a8   : > { %662 = vadd.xlane.f32.xlu0 %v661_v38 }
 0x1a9   : > { %650 = vst.msk [vmem:[%s357_s30] sm:$0x3] %vm648_vm6, %v644_v39 }
 0x22f   : > { %v656_v43 = vpop.xlane.xlu1 %655 }
 0x231   : > { %v663_v40 = vpop.xlane.xlu0 %662 }
 0x232   : > { %v665_v42 = vrot.slane %v663_v40, 7 }
 0x234   : > { %v667_v44 = vsel %vm651_vm5, %v656_v43, %v665_v42 }
 0x235   : > { %v669_v45 = vadd.f32 %v668_v41, %v667_v44 }
 0x237   : > { %671 = vst.msk [vmem:[%s956_s14] sm:$0x3] %vm367_vm0, %v669_v45 }
 0x238 PF: > { %s18_s26 = sadd.s32 1, %s878_s26   ;;  %s1002_s24 = smov %s874_s25 }
 0x239   : > { %p15_p5 = scmp.ge.s32.totalorder %s18_s26, 4   ;;  %s1003_s25 = smov %s1005_s27 }
 0x23b   :  { %17 = sbr.rel (!%p15_p5) target bundleno = 2 (0x2), region = 93 }

</bundles_post_ra>
